<compile_context>
chip_gen: v7x
topology: tpu7x:2x2x1
jax: 0.10.0
libtpu: 0.0.40
codegen_flags: <defaults>
</compile_context>

<pallas_src>
import functools

import jax
import jax.numpy as jnp
from jax import lax
from jax.experimental import pallas as pl
from jax.experimental.pallas import tpu as pltpu


def _conv3x3_fused(xc, xu, xd, w_packed, e0, *, height, width, pad):
    """Fused 9-tap 3x3 'same' conv on one flattened-spatial tile.

    xc:       (C_in, TS)   tile, global flat elements [e0, e0+TS)
    xu:       (C_in, pad)  slab just above: elements [e0-pad, e0)
                           (clamped/garbage at the image top -> fully masked)
    xd:       (C_in, pad)  slab just below: elements [e0+TS, e0+TS+pad)
                           (clamped/garbage at the image bottom -> fully masked)
    w_packed: (C_out, 9*C_in)  columns ordered tap-major (ky, kx), channel-minor
    e0:       global flat offset of the tile (traced or python int)
    Returns (C_out, TS) float32.
    """
    c_in, ts = xc.shape
    # [halo | tile | halo]: 128-aligned concat boundaries -> plain tile copies.
    xext = jnp.concatenate([xu, xc, xd], axis=1)          # (C_in, pad+TS+pad)

    # Border-validity masks, channel-invariant -> (1, TS), broadcast in where().
    e = e0 + lax.broadcasted_iota(jnp.int32, (1, ts), 1)  # global flat index
    col = e % width
    not_top = e >= width                                  # row >= 1
    not_bot = e < (height - 1) * width                    # row <= H-2
    not_left = col >= 1
    not_right = col < width - 1

    zero = jnp.zeros((), xc.dtype)
    taps = []
    for ky in range(3):
        for kx in range(3):
            dy, dx = ky - 1, kx - 1
            d = dy * width + dx                           # flat-space offset
            v = xext[:, pad + d: pad + d + ts]            # static offset view
            m = None
            if dy < 0:
                m = not_top
            elif dy > 0:
                m = not_bot
            if dx < 0:
                m = not_left if m is None else (m & not_left)
            elif dx > 0:
                m = not_right if m is None else (m & not_right)
            if m is not None:
                v = jnp.where(m, v, zero)
            taps.append(v)

    rhs = jnp.concatenate(taps, axis=0)                   # (9*C_in, TS)
    return jnp.dot(w_packed, rhs, preferred_element_type=jnp.float32)


def _conv_kernel_tiled(xc_ref, xu_ref, xd_ref, w_ref, o_ref, *, height, width, pad):
    ts = xc_ref.shape[2]
    e0 = pl.program_id(1) * ts
    acc = _conv3x3_fused(xc_ref[0], xu_ref[0], xd_ref[0], w_ref[...], e0,
                         height=height, width=width, pad=pad)
    o_ref[0] = acc.astype(o_ref.dtype)


def _conv_kernel_whole(x_ref, w_ref, o_ref, *, height, width):
    # Fallback for spatial sizes that don't meet the 128-divisibility needed by
    # the halo blocks: whole image per batch element, zero halos.
    pad = width + 1
    xc = x_ref[0]
    z = jnp.zeros((xc.shape[0], pad), xc.dtype)
    acc = _conv3x3_fused(xc, z, z, w_ref[...], 0, height=height, width=width, pad=pad)
    o_ref[0] = acc.astype(o_ref.dtype)


def _pick_spatial_tile(s, halo, c_in, c_out, itemsize, spatial_tile):
    """Pick TILE_S: a multiple of `halo` that divides `s`, with a modest VMEM budget."""
    if spatial_tile is not None:
        if spatial_tile % halo or s % spatial_tile:
            raise ValueError(
                f"spatial_tile={spatial_tile} must be a multiple of {halo} and divide {s}")
        return spatial_tile
    if s % halo:
        return None                      # use the whole-image fallback path
    n = s // halo
    # Rough per-tile VMEM: double-buffered streamed blocks + in-kernel slab/rhs/acc.
    per_elem = (2 * (c_in + c_out) + 11 * c_in) * itemsize + 4 * c_out
    budget = 8 * 1024 * 1024             # stays under the 16 MiB v5e scoped default
    max_ts = max(halo, budget // max(per_elem, 1))
    best = halo
    for k in range(1, n + 1):
        if n % k == 0 and k * halo <= max_ts:
            best = k * halo
    return best


@functools.partial(jax.jit, static_argnames=("spatial_tile",))
def upsample_forward(x, weight, spatial_tile=None):
    """Upsample.forward: Conv2d(n_feat, 2*n_feat, 3, p=1, bias=False) + PixelShuffle(2).

    x:      (B, n_feat, H, W)          NCHW
    weight: (2*n_feat, n_feat, 3, 3)   PyTorch OIHW conv weight
    returns (B, n_feat//2, 2H, 2W)     NCHW
    """
    b, c_in, h, w = x.shape
    c_out = weight.shape[0]              # = 2 * n_feat
    assert weight.shape == (c_out, c_in, 3, 3) and c_out % 4 == 0
    s = h * w

    x_flat = x.reshape(b, c_in, s)       # contiguous collapse -> no data movement
    # (O, I, ky, kx) -> (O, ky, kx, I) -> (O, 9*I): tap-major, channel-minor columns,
    # matching the in-kernel tap stacking order.
    w_packed = jnp.transpose(weight, (0, 2, 3, 1)).reshape(c_out, 9 * c_in)

    halo = 128 * pl.cdiv(w + 1, 128)     # >= W+1 elements of flat-space halo, lane-aligned
    ts = _pick_spatial_tile(s, halo, c_in, c_out, x.dtype.itemsize, spatial_tile)

    if ts is None:
        conv = pl.pallas_call(
            functools.partial(_conv_kernel_whole, height=h, width=w),
            out_shape=jax.ShapeDtypeStruct((b, c_out, s), x.dtype),
            grid=(b,),
            in_specs=[
                pl.BlockSpec((1, c_in, s), lambda i: (i, 0, 0)),
                pl.BlockSpec((c_out, 9 * c_in), lambda i: (0, 0)),
            ],
            out_specs=pl.BlockSpec((1, c_out, s), lambda i: (i, 0, 0)),
            compiler_params=pltpu.CompilerParams(
                dimension_semantics=("parallel",)),
        )(x_flat, w_packed)
    else:
        n_tiles = s // ts
        k_halo = ts // halo              # tile size in halo-block units
        n_halo_blocks = s // halo

        def center_map(i, t):
            return (i, 0, t)

        def up_map(i, t):                # slab [e0-halo, e0); clamped+masked at the top
            return (i, 0, jnp.maximum(t * k_halo - 1, 0))

        def dn_map(i, t):                # slab [e0+ts, e0+ts+halo); clamped+masked at the bottom
            return (i, 0, jnp.minimum((t + 1) * k_halo, n_halo_blocks - 1))

        conv = pl.pallas_call(
            functools.partial(_conv_kernel_tiled, height=h, width=w, pad=halo),
            out_shape=jax.ShapeDtypeStruct((b, c_out, s), x.dtype),
            grid=(b, n_tiles),
            in_specs=[
                pl.BlockSpec((1, c_in, ts), center_map),
                pl.BlockSpec((1, c_in, halo), up_map),
                pl.BlockSpec((1, c_in, halo), dn_map),
                pl.BlockSpec((c_out, 9 * c_in), lambda i, t: (0, 0)),  # resident weight
            ],
            out_specs=pl.BlockSpec((1, c_out, ts), center_map),
            compiler_params=pltpu.CompilerParams(
                dimension_semantics=("parallel", "parallel")),
        )(x_flat, x_flat, x_flat, w_packed)

    # PixelShuffle(2): out[b, c, 2h+i, 2w+j] = conv[b, 4c + 2i + j, h, w]
    # (pure layout reorganization; see TODO at the top about in-kernel fusion).
    r = 2
    k = c_out // (r * r)
    y = conv.reshape(b, k, r, r, h, w)
    y = jnp.transpose(y, (0, 1, 4, 2, 5, 3))
    return y.reshape(b, k, h * r, w * r)


def _reference(x, weight):
    """Pure-XLA reference: conv via lax.conv_general_dilated + pixel shuffle."""
    conv = lax.conv_general_dilated(
        x.astype(jnp.float32), weight.astype(jnp.float32),
        window_strides=(1, 1), padding=((1, 1), (1, 1)),
        dimension_numbers=("NCHW", "OIHW", "NCHW"))
    b, c_out, h, w = conv.shape
    r = 2
    k = c_out // (r * r)
    y = conv.reshape(b, k, r, r, h, w).transpose(0, 1, 4, 2, 5, 3)
    return y.reshape(b, k, h * r, w * r)


if __name__ == "__main__":
    key = jax.random.PRNGKey(0)
    k1, k2, k3, k4 = jax.random.split(key, 4)
    ok = True

    # Case 1: spec-sized shapes (B=2, n_feat=4, 16x16).  Auto tile -> T=1 tile.
    B, n_feat, H, W = 2, 4, 16, 16
    x = jax.random.normal(k1, (B, n_feat, H, W), dtype=jnp.float32)
    wgt = jax.random.normal(k2, (2 * n_feat, n_feat, 3, 3), dtype=jnp.float32) * 0.1
    y = jax.block_until_ready(upsample_forward(x, wgt))
    y_ref = _reference(x, wgt)
    err1 = float(jnp.max(jnp.abs(y.astype(jnp.float32) - y_ref)))
    ok = ok and (y.shape == (B, n_feat // 2, 2 * H, 2 * W)) and (err1 < 1e-3)

    # Case 2: 32x32 image with an explicit 256-element spatial tile, exercising
    # the multi-tile halo path (grid = (1, 4)) and B=1.
    B2, nf2, H2, W2 = 1, 8, 32, 32
    x2 = jax.random.normal(k3, (B2, nf2, H2, W2), dtype=jnp.float32)
    w2 = jax.random.normal(k4, (2 * nf2, nf2, 3, 3), dtype=jnp.float32) * 0.1
    y2 = jax.block_until_ready(upsample_forward(x2, w2, spatial_tile=256))
    y2_ref = _reference(x2, w2)
    err2 = float(jnp.max(jnp.abs(y2.astype(jnp.float32) - y2_ref)))
    ok = ok and (y2.shape == (B2, nf2 // 2, 2 * H2, 2 * W2)) and (err2 < 1e-3)

    if ok:
        print("KERNEL_OK")
    else:
        print(f"MISMATCH: shapes={y.shape},{y2.shape} err1={err1} err2={err2}")
</pallas_src>

<mosaic_0001>
module attributes {stable_mosaic.version = 11 : i64} {
  func.func @_conv_kernel_tiled(%arg0: i32, %arg1: i32, %arg2: memref<1x4x256xf32, #tpu.memory_space<vmem>>, %arg3: memref<1x4x128xf32, #tpu.memory_space<vmem>>, %arg4: memref<1x4x128xf32, #tpu.memory_space<vmem>>, %arg5: memref<8x36xf32, #tpu.memory_space<vmem>>, %arg6: memref<1x8x256xf32, #tpu.memory_space<vmem>>) attributes {dimension_semantics = [#tpu.dimension_semantics<parallel>, #tpu.dimension_semantics<parallel>], iteration_bounds = array<i64: 2, 1>, scalar_prefetch = 0 : i64, scratch_operands = 0 : i64, tpu.core_type = #tpu.core_type<tc>, window_params = [{transform_indices = @transform_0, window_bounds = array<i64: 1, 4, 256>}, {transform_indices = @transform_1, window_bounds = array<i64: 1, 4, 128>}, {transform_indices = @transform_2, window_bounds = array<i64: 1, 4, 128>}, {pipeline_mode = #tpu.pipeline_mode<synchronous>, transform_indices = @transform_3, window_bounds = array<i64: 8, 36>}, {transform_indices = @transform_4, window_bounds = array<i64: 1, 8, 256>}]} {
    %c256_i32 = arith.constant 256 : i32
    %0 = arith.muli %arg1, %c256_i32 : i32
    %c0 = arith.constant 0 : index
    %c0_0 = arith.constant 0 : index
    %c0_1 = arith.constant 0 : index
    %1 = vector.load %arg2[%c0, %c0_0, %c0_1] : memref<1x4x256xf32, #tpu.memory_space<vmem>>, vector<1x4x256xf32>
    %2 = vector.shape_cast %1 : vector<1x4x256xf32> to vector<4x256xf32>
    %c0_2 = arith.constant 0 : index
    %c0_3 = arith.constant 0 : index
    %c0_4 = arith.constant 0 : index
    %3 = vector.load %arg3[%c0_2, %c0_3, %c0_4] : memref<1x4x128xf32, #tpu.memory_space<vmem>>, vector<1x4x128xf32>
    %4 = vector.shape_cast %3 : vector<1x4x128xf32> to vector<4x128xf32>
    %c0_5 = arith.constant 0 : index
    %c0_6 = arith.constant 0 : index
    %c0_7 = arith.constant 0 : index
    %5 = vector.load %arg4[%c0_5, %c0_6, %c0_7] : memref<1x4x128xf32, #tpu.memory_space<vmem>>, vector<1x4x128xf32>
    %6 = vector.shape_cast %5 : vector<1x4x128xf32> to vector<4x128xf32>
    %c0_8 = arith.constant 0 : index
    %c0_9 = arith.constant 0 : index
    %7 = vector.load %arg5[%c0_8, %c0_9] : memref<8x36xf32, #tpu.memory_space<vmem>>, vector<8x36xf32>
    %8 = tpu.concatenate %4, %2, %6 in 1 : vector<4x128xf32>, vector<4x256xf32>, vector<4x128xf32> -> vector<4x512xf32>
    %9 = tpu.iota {dimensions = array<i32: 1>} : vector<1x256xi32>
    %10 = vector.broadcast %0 : i32 to vector<1x256xi32>
    %11 = arith.addi %10, %9 : vector<1x256xi32>
    %c16_i32 = arith.constant 16 : i32
    %c0_i32 = arith.constant 0 : i32
    %12 = arith.cmpi eq, %c16_i32, %c0_i32 : i32
    %c1_i32 = arith.constant 1 : i32
    %13 = arith.select %12, %c1_i32, %c16_i32 : i32
    %14 = vector.broadcast %13 : i32 to vector<1x256xi32>
    %15 = arith.remsi %11, %14 : vector<1x256xi32>
    %c0_i32_10 = arith.constant 0 : i32
    %16 = vector.broadcast %c0_i32_10 : i32 to vector<1x256xi32>
    %17 = arith.cmpi ne, %15, %16 : vector<1x256xi32>
    %c0_i32_11 = arith.constant 0 : i32
    %18 = vector.broadcast %c0_i32_11 : i32 to vector<1x256xi32>
    %19 = arith.cmpi slt, %15, %18 : vector<1x256xi32>
    %c0_i32_12 = arith.constant 0 : i32
    %20 = arith.cmpi slt, %13, %c0_i32_12 : i32
    %21 = vector.broadcast %20 : i1 to vector<1x256xi1>
    %22 = vector.broadcast %21 : vector<1x256xi1> to vector<1x256xi1>
    %23 = arith.xori %19, %22 : vector<1x256xi1>
    %24 = arith.andi %23, %17 : vector<1x256xi1>
    %25 = vector.broadcast %13 : i32 to vector<1x256xi32>
    %26 = arith.addi %15, %25 : vector<1x256xi32>
    %27 = arith.select %24, %26, %15 : vector<1x256xi1>, vector<1x256xi32>
    %c16_i32_13 = arith.constant 16 : i32
    %28 = vector.broadcast %c16_i32_13 : i32 to vector<1x256xi32>
    %29 = arith.cmpi sge, %11, %28 : vector<1x256xi32>
    %c240_i32 = arith.constant 240 : i32
    %30 = vector.broadcast %c240_i32 : i32 to vector<1x256xi32>
    %31 = arith.cmpi slt, %11, %30 : vector<1x256xi32>
    %c1_i32_14 = arith.constant 1 : i32
    %32 = vector.broadcast %c1_i32_14 : i32 to vector<1x256xi32>
    %33 = arith.cmpi sge, %27, %32 : vector<1x256xi32>
    %c15_i32 = arith.constant 15 : i32
    %34 = vector.broadcast %c15_i32 : i32 to vector<1x256xi32>
    %35 = arith.cmpi slt, %27, %34 : vector<1x256xi32>
    %36 = vector.extract_strided_slice %8 {offsets = [0, 111], sizes = [4, 256], strides = [1, 1]} : vector<4x512xf32> to vector<4x256xf32>
    %37 = arith.andi %29, %33 : vector<1x256xi1>
    %cst = arith.constant 0.000000e+00 : f32
    %38 = vector.shape_cast %37 : vector<1x256xi1> to vector<1x256xi1>
    %39 = vector.broadcast %38 : vector<1x256xi1> to vector<4x256xi1>
    %40 = vector.broadcast %cst : f32 to vector<4x256xf32>
    %41 = arith.select %39, %36, %40 : vector<4x256xi1>, vector<4x256xf32>
    %42 = vector.extract_strided_slice %8 {offsets = [0, 112], sizes = [4, 256], strides = [1, 1]} : vector<4x512xf32> to vector<4x256xf32>
    %cst_15 = arith.constant 0.000000e+00 : f32
    %43 = vector.shape_cast %29 : vector<1x256xi1> to vector<1x256xi1>
    %44 = vector.broadcast %43 : vector<1x256xi1> to vector<4x256xi1>
    %45 = vector.broadcast %cst_15 : f32 to vector<4x256xf32>
    %46 = arith.select %44, %42, %45 : vector<4x256xi1>, vector<4x256xf32>
    %47 = vector.extract_strided_slice %8 {offsets = [0, 113], sizes = [4, 256], strides = [1, 1]} : vector<4x512xf32> to vector<4x256xf32>
    %48 = arith.andi %29, %35 : vector<1x256xi1>
    %cst_16 = arith.constant 0.000000e+00 : f32
    %49 = vector.shape_cast %48 : vector<1x256xi1> to vector<1x256xi1>
    %50 = vector.broadcast %49 : vector<1x256xi1> to vector<4x256xi1>
    %51 = vector.broadcast %cst_16 : f32 to vector<4x256xf32>
    %52 = arith.select %50, %47, %51 : vector<4x256xi1>, vector<4x256xf32>
    %53 = vector.extract_strided_slice %8 {offsets = [0, 127], sizes = [4, 256], strides = [1, 1]} : vector<4x512xf32> to vector<4x256xf32>
    %cst_17 = arith.constant 0.000000e+00 : f32
    %54 = vector.shape_cast %33 : vector<1x256xi1> to vector<1x256xi1>
    %55 = vector.broadcast %54 : vector<1x256xi1> to vector<4x256xi1>
    %56 = vector.broadcast %cst_17 : f32 to vector<4x256xf32>
    %57 = arith.select %55, %53, %56 : vector<4x256xi1>, vector<4x256xf32>
    %58 = vector.extract_strided_slice %8 {offsets = [0, 128], sizes = [4, 256], strides = [1, 1]} : vector<4x512xf32> to vector<4x256xf32>
    %59 = vector.extract_strided_slice %8 {offsets = [0, 129], sizes = [4, 256], strides = [1, 1]} : vector<4x512xf32> to vector<4x256xf32>
    %cst_18 = arith.constant 0.000000e+00 : f32
    %60 = vector.shape_cast %35 : vector<1x256xi1> to vector<1x256xi1>
    %61 = vector.broadcast %60 : vector<1x256xi1> to vector<4x256xi1>
    %62 = vector.broadcast %cst_18 : f32 to vector<4x256xf32>
    %63 = arith.select %61, %59, %62 : vector<4x256xi1>, vector<4x256xf32>
    %64 = vector.extract_strided_slice %8 {offsets = [0, 143], sizes = [4, 256], strides = [1, 1]} : vector<4x512xf32> to vector<4x256xf32>
    %65 = arith.andi %31, %33 : vector<1x256xi1>
    %cst_19 = arith.constant 0.000000e+00 : f32
    %66 = vector.shape_cast %65 : vector<1x256xi1> to vector<1x256xi1>
    %67 = vector.broadcast %66 : vector<1x256xi1> to vector<4x256xi1>
    %68 = vector.broadcast %cst_19 : f32 to vector<4x256xf32>
    %69 = arith.select %67, %64, %68 : vector<4x256xi1>, vector<4x256xf32>
    %70 = vector.extract_strided_slice %8 {offsets = [0, 144], sizes = [4, 256], strides = [1, 1]} : vector<4x512xf32> to vector<4x256xf32>
    %cst_20 = arith.constant 0.000000e+00 : f32
    %71 = vector.shape_cast %31 : vector<1x256xi1> to vector<1x256xi1>
    %72 = vector.broadcast %71 : vector<1x256xi1> to vector<4x256xi1>
    %73 = vector.broadcast %cst_20 : f32 to vector<4x256xf32>
    %74 = arith.select %72, %70, %73 : vector<4x256xi1>, vector<4x256xf32>
    %75 = vector.extract_strided_slice %8 {offsets = [0, 145], sizes = [4, 256], strides = [1, 1]} : vector<4x512xf32> to vector<4x256xf32>
    %76 = arith.andi %31, %35 : vector<1x256xi1>
    %cst_21 = arith.constant 0.000000e+00 : f32
    %77 = vector.shape_cast %76 : vector<1x256xi1> to vector<1x256xi1>
    %78 = vector.broadcast %77 : vector<1x256xi1> to vector<4x256xi1>
    %79 = vector.broadcast %cst_21 : f32 to vector<4x256xf32>
    %80 = arith.select %78, %75, %79 : vector<4x256xi1>, vector<4x256xf32>
    %81 = tpu.concatenate %41, %46, %52, %57, %58, %63, %69, %74, %80 in 0 : vector<4x256xf32>, vector<4x256xf32>, vector<4x256xf32>, vector<4x256xf32>, vector<4x256xf32>, vector<4x256xf32>, vector<4x256xf32>, vector<4x256xf32>, vector<4x256xf32> -> vector<36x256xf32>
    %cst_22 = arith.constant dense<0.000000e+00> : vector<8x256xf32>
    %82 = tpu.matmul %7, %81, %cst_22 {dimension_numbers = #tpu.dot_dimension_numbers<[1], [0], [0], [1], [0, 0, 1, 1], [], []>} : vector<8x36xf32>, vector<36x256xf32>, vector<8x256xf32> -> vector<8x256xf32>
    %c0_23 = arith.constant 0 : index
    %c0_24 = arith.constant 0 : index
    %c0_25 = arith.constant 0 : index
    %83 = vector.load %arg6[%c0_23, %c0_24, %c0_25] : memref<1x8x256xf32, #tpu.memory_space<vmem>>, vector<1x8x256xf32>
    %84 = vector.shape_cast %83 : vector<1x8x256xf32> to vector<8x256xf32>
    %85 = vector.shape_cast %82 : vector<8x256xf32> to vector<1x8x256xf32>
    tpu.vector_store %arg6[%c0_23, %c0_24, %c0_25], %85 {strides = array<i32>} : memref<1x8x256xf32, #tpu.memory_space<vmem>>, vector<1x8x256xf32>,
    return
  }
  func.func @transform_0(%arg0: i32, %arg1: i32) -> (i32, i32, i32) {
    %c0_i32 = arith.constant 0 : i32
    %c0_i32_0 = arith.constant 0 : i32
    return %arg0, %c0_i32, %arg1 : i32, i32, i32
  }
  func.func @transform_1(%arg0: i32, %arg1: i32) -> (i32, i32, i32) {
    %c2_i32 = arith.constant 2 : i32
    %0 = arith.muli %arg1, %c2_i32 : i32
    %c1_i32 = arith.constant 1 : i32
    %1 = arith.subi %0, %c1_i32 : i32
    %c0_i32 = arith.constant 0 : i32
    %2 = arith.maxsi %1, %c0_i32 : i32
    %c0_i32_0 = arith.constant 0 : i32
    %c0_i32_1 = arith.constant 0 : i32
    return %arg0, %c0_i32_0, %2 : i32, i32, i32
  }
  func.func @transform_2(%arg0: i32, %arg1: i32) -> (i32, i32, i32) {
    %c1_i32 = arith.constant 1 : i32
    %0 = arith.addi %arg1, %c1_i32 : i32
    %c2_i32 = arith.constant 2 : i32
    %1 = arith.muli %0, %c2_i32 : i32
    %c1_i32_0 = arith.constant 1 : i32
    %2 = arith.minsi %1, %c1_i32_0 : i32
    %c0_i32 = arith.constant 0 : i32
    %c0_i32_1 = arith.constant 0 : i32
    return %arg0, %c0_i32, %2 : i32, i32, i32
  }
  func.func @transform_3(%arg0: i32, %arg1: i32) -> (i32, i32) {
    %c0_i32 = arith.constant 0 : i32
    %c0_i32_0 = arith.constant 0 : i32
    %c0_i32_1 = arith.constant 0 : i32
    return %c0_i32, %c0_i32_0 : i32, i32
  }
  func.func @transform_4(%arg0: i32, %arg1: i32) -> (i32, i32, i32) {
    %c0_i32 = arith.constant 0 : i32
    %c0_i32_0 = arith.constant 0 : i32
    return %arg0, %c0_i32, %arg1 : i32, i32, i32
  }
}

</mosaic_0001>

<bundles_post_ra>
// kernel: upsample_forward.1
= control target key start
LH: loop header
LB: loop body
LE: loop exit
PB: predicated region body
PF: predicated region fallthrough
CT: control target
= control target key end

     0   :  { %s945_s15 = smov 0   ;;  %s947_s16 = smov 0   ;;  %s1096_s0 = inlined_call_operand.vmem [shape: f32[2,4,256], index: 0, kind: input, shape index: {}, may-alias: {0,1,2}]   ;;  %s1097_s1 = inlined_call_operand.vmem [shape: f32[2,4,256], index: 1, kind: input, shape index: {}, may-alias: {0,1,2}]   ;;  %s1098_s2 = inlined_call_operand.vmem [shape: f32[2,4,256], index: 2, kind: input, shape index: {}, may-alias: {0,1,2}]   ;;  %s1099_s3 = inlined_call_operand.vmem [shape: f32[8,36], index: 3, kind: input, shape index: {}]   ;;  %s1100_s4 = inlined_call_operand.vmem [shape: f32[2,8,256], index: 4, kind: output, shape index: {}]  }
   0x1   :  { %s949_s17 = smov 0  }
   0x2 LB: > { %s26_s18 = sadd.s32 1, %s905_s16  ;;  %p790_p0 = scmp.ge.s32.totalorder %s909_s17, 1  ;;  %s909_s17 = sphi %s949_s17, %s14_s17   ;;  %s905_s16 = sphi %s947_s16, %s1114_s16   ;;  %s901_s15 = sphi %s945_s15, %s1113_s15  }
   0x3   : > { %p28_p1 = scmp.ge.s32.totalorder %s26_s18, 2  ;;  %p245_p2 = scmp.lt.s32.totalorder %s909_s17, 3 }
   0x5   : > { %s1116_s18 = smov (%p28_p1, %s26_s18), 0  ;;  %p246_p3 = pnand %p790_p0, %p245_p2 }
   0x6   : > { %p304_p4 = scmp.lt.s32.totalorder (!%p246_p3), %s901_s15, 1  ;;  %s911_s26 = smov (!%p246_p3), 1   ;;  %v918_v7 = vmov (!%p246_p3), 0.0   ;;  %v363_v8 = vlaneseq (!%p246_p3)  ;;  %vm431_vm0 = vcmask (!%p246_p3), 130048   ;;  %vm467_vm1 = vcmask (!%p246_p3), 7168  }
   0x7   : > { %249 = sbr.rel (%p246_p3) target bundleno = 385 (0x181), region = 36  ;;  %s912_s28 = smov (!%p246_p3), 16   ;;  %654 = vmatprep.mubr.f32.mxu0 (!%p246_p3), %v918_v7  ;;  %vm450_vm3 = vcmask (!%p246_p3), 121856   ;;  %vm414_vm8 = vcmask (!%p246_p3), 138240   ;;  %vm571_vm10 = vcmask (!%p246_p3), 1043456   ;;  %vm521_vm13 = vcmask (!%p246_p3), 916480  }
   0x8   : > { %s913_s6 = smov (!%p246_p3), 15   ;;  %s914_s7 = smov (!%p246_p3), 17   ;;  %v364_v9 = vand.u32 (!%p246_p3), 127, %v363_v8  ;;  %vm485_vm14 = vcmask (!%p246_p3), 1039360   ;;  %vm504_vm15 = vcmask (!%p246_p3), 924672  }
   0x9   : > { %s915_s8 = smov (!%p246_p3), 112   ;;  %s916_s9 = smov (!%p246_p3), 127  }
   0xa   : > { %s917_s10 = smov (!%p246_p3), 113   ;;  %s919_s11 = smov (!%p246_p3), 111   ;;  %v991_v11 = vadd.s32 (!%p246_p3), 128, %v364_v9  ;;  %v373_v17 = vand.u32 (!%p246_p3), 15, %v364_v9  ;;  %vm393_vm2 = vcmp.ge.s32.totalorder (!%p246_p3), %v364_v9, 16 }
   0xc   : > { %v380_v14 = vand.u32 (!%p246_p3), 15, %v991_v11  ;;  %vm999_vm5 = vcmp.lt.s32.totalorder (!%p246_p3), %v373_v17, 15  ;;  %vm1003_vm6 = vcmp.ge.s32.totalorder (!%p246_p3), %v373_v17, 1  ;;  %vm396_vm12 = vcmp.lt.s32.totalorder (!%p246_p3), %v991_v11, 240  ;;  %v359_v11 = vld [vmem:[%s1099_s3] sm:$0xff] (!%p246_p3) }
   0xd   : > { %vm1018_vm9 = vmand (!%p246_p3), %vm393_vm2, %vm999_vm5 }
   0xe   : > { %s1118_s15 = smov (!%p304_p4, %s901_s15), 1  ;;  %vm994_vm4 = vcmp.ge.s32.totalorder %v380_v14, 1  ;;  %vm1007_vm7 = vcmp.lt.s32.totalorder %v380_v14, 15  ;;  %vm1031_vm11 = vmand %vm393_vm2, %vm1003_vm6 }
   0xf   : > { %s804_s19 = sshll.u32 %s1118_s15, 3  ;;  %s808_s14 = sshll.u32 %s1118_s15, 4 }
  0x10   : > { %s324_s22 = scalar_lea.vmem %s1097_s1, %s804_s19  ;;  %s311_s25 = scalar_lea.vmem %s1096_s0, %s804_s19 }
  0x11   : > { %v357_v0 = vld [vmem:[%s324_s22] sm:$0xf]  ;;  %s807_s27 = sadd.s32 4, %s804_s19  ;;  %s353_s21 = scalar_lea.vmem %s1100_s4, %s808_s14 }
  0x12   : > { %461 = vrot.lane.b32.xlu1 %v357_v0, %s911_s26  ;;  %v972_v1 = vld [vmem:[%s311_s25] sm:$0xff]  ;;  %s340_s5 = scalar_lea.vmem %s1098_s2, %s807_s27 }
  0x13   : > { %v976_v2 = vcombine.high %v972_v1, %v972_v1  ;;  %v851_v3 = vpack.i.bf16 %v972_v1, %v357_v0  ;;  %v358_v5 = vld [vmem:[%s340_s5] sm:$0xf] }
  0x15   : > { %852 = vrot.lane.b32.xlu0 %v851_v3, %s912_s28  ;;  %v856_v4 = vpack.i.bf16 %v976_v2, %v972_v1  ;;  %v876_v6 = vpack.i.bf16 %v358_v5, %v976_v2 }
  0x16   : > { %429 = vrot.lane.b32.xlu1 %v976_v2, %s912_s28 }
  0x19   : > { %857 = vrot.lane.b32.xlu0 %v856_v4, %s911_s26 }
  0x1a   : > { %867 = vrot.lane.b32.xlu1 %v856_v4, %s913_s6 }
  0x1d   : > { %862 = vrot.lane.b32.xlu0 %v856_v4, %s914_s7 }
  0x1e   : > { %444 = vrot.lane.b32.xlu1 %v357_v0, %s913_s6 }
  0x21   : > { %408 = vrot.lane.b32.xlu0 %v357_v0, %s914_s7 }
  0x22   : > { %877 = vrot.lane.b32.xlu1 %v876_v6, %s915_s8 }
  0x25   : > { %872 = vrot.lane.b32.xlu0 %v876_v6, %s916_s9 }
  0x26   : > { %882 = vrot.lane.b32.xlu1 %v876_v6, %s917_s10 }
  0x29   : > { %479 = vrot.lane.b32.xlu0 %v972_v1, %s916_s9 }
  0x2a   : > { %498 = vrot.lane.b32.xlu1 %v972_v1, %s917_s10 }
  0x2d   : > { %515 = vrot.lane.b32.xlu0 %v972_v1, %s915_s8 }
  0x2e   : > { %538 = vrot.lane.b32.xlu1 %v358_v5, %s919_s11 }
  0x31   : > { %536 = vrot.lane.b32.xlu0 %v976_v2, %s919_s11 }
  0x35   : > { %534 = vrot.lane.b32.xlu0 %v972_v1, %s919_s11 }
  0x84   : > { %v462_v10 = vpop.permute.xlu1 %461 }
  0x87   : > { %v853_v12 = vpop.permute.xlu0 %852 }
  0x88   : > { %v430_v13 = vpop.permute.xlu1 %429  ;;  %v855_v15 = vunpack.i.h.bf16 %v853_v12  ;;  %v854_v16 = vunpack.i.l.bf16 %v853_v12 }
  0x8a   : > { %v432_v23 = vsel %vm431_vm0, %v854_v16, %v855_v15  ;;  %v433_v31 = vsel %vm431_vm0, %v855_v15, %v430_v13  ;;  %vm493_vm0 = vmand %vm396_vm12, %vm994_vm4 }
  0x8b   : > { %v858_v18 = vpop.permute.xlu0 %857  ;;  %v436_v40 = vsel %vm393_vm2, %v432_v23, 0.0  ;;  %v550_v44 = vrot.slane %v433_v31, 4  ;;  %vm529_vm2 = vmand %vm396_vm12, %vm1007_vm7 }
  0x8c   : > { %v860_v19 = vunpack.i.h.bf16 %v858_v18  ;;  %v859_v20 = vunpack.i.l.bf16 %v858_v18  ;;  %v868_v21 = vpop.permute.xlu1 %867  ;;  %v549_v50 = vrot.slane %v436_v40, 4 }
  0x8d   : > { %v870_v24 = vunpack.i.h.bf16 %v868_v21  ;;  %v869_v25 = vunpack.i.l.bf16 %v868_v21 }
  0x8e   : > { %v468_v27 = vsel %vm467_vm1, %v462_v10, %v859_v20  ;;  %v469_v28 = vsel %vm467_vm1, %v859_v20, %v860_v19  ;;  %vm540_vm1 = vcmask 908288  }
  0x8f   : > { %v863_v32 = vpop.permute.xlu0 %862  ;;  %v452_v33 = vsel %vm450_vm3, %v869_v25, %v870_v24  ;;  %v473_v34 = vsel %vm994_vm4, %v469_v28, 0.0  ;;  %v472_v43 = vsel %vm1003_vm6, %v468_v27, 0.0 }
  0x90   : > { %v865_v35 = vunpack.i.h.bf16 %v863_v32  ;;  %v864_v36 = vunpack.i.l.bf16 %v863_v32  ;;  %v445_v38 = vpop.permute.xlu1 %444  ;;  %v556_v39 = vrot.slane %v473_v34, 4  ;;  %v456_v42 = vsel %vm1007_vm7, %v452_v33, 0.0 }
  0x91   : > { %v451_v41 = vsel %vm450_vm3, %v445_v38, %v869_v25  ;;  %v555_v55 = vrot.slane %v472_v43, 4  ;;  %vm580_vm3 = vcmask 293888  }
  0x92   : > { %v416_v46 = vsel %vm414_vm8, %v864_v36, %v865_v35  ;;  %v455_v47 = vsel %vm1018_vm9, %v451_v41, 0.0  ;;  %v575_v54 = vsel %vm571_vm10, %v456_v42, %v556_v39 }
  0x93   : > { %v409_v48 = vpop.permute.xlu0 %408  ;;  %v420_v49 = vsel %vm994_vm4, %v416_v46, 0.0  ;;  %v574_v61 = vsel %vm571_vm10, %v455_v47, %v555_v55 }
  0x94   : > { %v415_v51 = vsel %vm414_vm8, %v409_v48, %v864_v36  ;;  %v878_v52 = vpop.permute.xlu1 %877  ;;  %v573_v53 = vsel %vm571_vm10, %v420_v49, %v550_v44 }
  0x95   : > { %v419_v56 = vsel %vm1031_vm11, %v415_v51, 0.0  ;;  %v880_v57 = vunpack.i.h.bf16 %v878_v52  ;;  %v879_v58 = vunpack.i.l.bf16 %v878_v52  ;;  %v810_v59 = vpack.c.bf16 %v575_v54, %v573_v53 }
  0x96   : > { %v572_v60 = vsel %vm571_vm10, %v419_v56, %v549_v50 }
  0x97   : > { %v873_v62 = vpop.permute.xlu0 %872  ;;  %811 = vmatprep.subr.bf16.mxu0 %v810_v59  ;;  %v812_v63 = vpack.c.bf16 %v574_v61, %v572_v60  ;;  %v523_v0 = vsel %vm521_vm13, %v879_v58, %v880_v57 }
  0x98   : > { %v875_v3 = vunpack.i.h.bf16 %v873_v62  ;;  %v874_v4 = vunpack.i.l.bf16 %v873_v62  ;;  %v883_v5 = vpop.permute.xlu1 %882  ;;  %v527_v6 = vsel %vm396_vm12, %v523_v0, 0.0 }
  0x99   : > { %v885_v7 = vunpack.i.h.bf16 %v883_v5  ;;  %v884_v8 = vunpack.i.l.bf16 %v883_v5  ;;  %813 = vmatpush1.bf16.msra.mxu0 %v812_v63  ;;  %v568_v9 = vrot.slane %v527_v6, 4 }
  0x9a   : > { %v487_v10 = vsel %vm485_vm14, %v874_v4, %v875_v3 }
  0x9b   : > { %v480_v12 = vpop.permute.xlu0 %479  ;;  %v491_v13 = vsel %vm1007_vm7, %v487_v10, 0.0  ;;  %v506_v14 = vsel %vm504_vm15, %v884_v8, %v885_v7 }
  0x9c   : > { %v486_v15 = vsel %vm485_vm14, %v480_v12, %v874_v4  ;;  %v562_v16 = vrot.slane %v491_v13, 4  ;;  %v499_v17 = vpop.permute.xlu1 %498  ;;  %v510_v18 = vsel %vm493_vm0, %v506_v14, 0.0 }
  0x9d   : > { %v490_v19 = vsel %vm999_vm5, %v486_v15, 0.0  ;;  %v579_v20 = vsel %vm571_vm10, %v510_v18, %v568_v9  ;;  %v505_v23 = vsel %vm504_vm15, %v499_v17, %v884_v8 }
  0x9e   : > { %v577_v21 = vsel %vm571_vm10, %v976_v2, %v562_v16  ;;  %v561_v22 = vrot.slane %v490_v19, 4  ;;  %v509_v32 = vsel %vm1003_vm6, %v505_v23, 0.0 }
  0x9f   : > { %v516_v24 = vpop.permute.xlu0 %515  ;;  %v814_v25 = vpack.c.bf16 %v579_v20, %v577_v21 }
  0xa0   : > { %v522_v27 = vsel %vm521_vm13, %v516_v24, %v879_v58  ;;  %v539_v31 = vpop.permute.xlu1 %538  ;;  %v576_v33 = vsel %vm571_vm10, %v972_v1, %v561_v22 }
  0xa1   : > { %v567_v28 = vrot.slane %v522_v27, 4  ;;  %815 = vmatprep.subr.bf16.mxu0 %v814_v25 }
  0xa3   : > { %v537_v2 = vpop.permute.xlu0 %536  ;;  %v578_v34 = vsel %vm571_vm10, %v509_v32, %v567_v28 }
  0xa4   : > { %v542_v35 = vsel %vm540_vm1, %v537_v2, %v539_v31  ;;  %v816_v36 = vpack.c.bf16 %v578_v34, %v576_v33 }
  0xa5   : > { %v546_v37 = vsel %vm529_vm2, %v542_v35, 0.0 }
  0xa6   : > { %817 = vmatpush1.bf16.msra.mxu0 %v816_v36 }
  0xa7   : > { %v535_v38 = vpop.permute.xlu0 %534  ;;  %799 = vmatprep.subr.msk.mxu0 %vm571_vm10, %v546_v37 }
  0xa8   : > { %v541_v29 = vsel %vm540_vm1, %v535_v38, %v537_v2 }
  0xa9   : > { %v545_v30 = vsel %vm999_vm5, %v541_v29, 0.0 }
  0xaa   : > { %800 = vmatpush1.msk.msra.mxu0 %vm571_vm10, %v545_v30 }
  0xab   : > { %801 = vmatmul.mubr.msk.f32.vlgmr.msra.gmra.mrb[0].mxu0 %vm580_vm3, %v359_v11 }
 0x17e   : > { %v656_v1 = vpop.f32.mrb[0].mxu0 }
 0x17f   : > { %661 = vst [vmem:[%s353_s21] sm:$0xff] %v656_v1  ;;  %v658_v39 = vpop.f32.mrb[1].mxu0 }
 0x180   : > { %662 = vst [vmem:[%s353_s21 + $0x8] sm:$0xff] %v658_v39 }
 0x181 PF: > { %s14_s17 = sadd.s32 1, %s909_s17   ;;  %s1113_s15 = smov %s905_s16 }
 0x182   : > { %p11_p5 = scmp.ge.s32.totalorder %s14_s17, 4   ;;  %s1114_s16 = smov %s1116_s18 }
 0x184   :  { %13 = sbr.rel (!%p11_p5) target bundleno = 2 (0x2), region = 72 }

</bundles_post_ra>
